<compile_context>
chip_gen: v7x
topology: tpu7x:2x2x1
jax: 0.10.0
libtpu: 0.0.40
codegen_flags: <defaults>
</compile_context>

<pallas_src>
import functools

import jax
import jax.numpy as jnp
from jax.experimental import pallas as pl
from jax.experimental.pallas import tpu as pltpu


# --------------------------------------------------------------------------
# Tiling helper
# --------------------------------------------------------------------------

def _pick_tile(n, target, multiple):
    """Largest t <= target with t % multiple == 0 and n % t == 0; else n.

    Returning n (single full tile) is always layout-legal because a block
    equal to the full array dims satisfies the (8, 128) rule.
    """
    if n <= target:
        return n
    t = (target // multiple) * multiple
    while t >= multiple:
        if n % t == 0:
            return t
        t -= multiple
    return n


# --------------------------------------------------------------------------
# Fused per-row kernel: gate projections + denoise + alpha-mix + readout
# --------------------------------------------------------------------------

def _fused_row_kernel(ecr_ref, ece_ref, wg_ref, bg_ref, wo_ref, bo_ref,
                      dc_ref, de_ref, rd_ref, *, alpha, d):
    ecr = ecr_ref[...]                                               # (TN, D)

    # One MXU pass over the concatenated [D, 2D] gate weight
    # (columns [:D] -> RCDN_CC sigmoid gate, [D:] -> RCDN_EC tanh branch).
    g = jnp.dot(ecr, wg_ref[...], preferred_element_type=jnp.float32)
    g = g + bg_ref[...]
    cc = jax.nn.sigmoid(g[:, :d])   # TODO(synk): RCDN_CC source not provided; sigmoid-gate stand-in.
    ev = jnp.tanh(g[:, d:])         # TODO(synk): RCDN_EC source not provided; tanh-projection stand-in.

    dc = cc * ecr                    # denoising_seq_emb_collaration
    de = ev * ecr                    # denoising_seq_emb_evolutionary
    dc_ref[...] = dc
    de_ref[...] = de

    # alpha-mix stays in VMEM (only consumed by the readout below).
    mix = alpha * dc + (1.0 - alpha) * de

    # TODO(synk): CFGKT transformer source not provided; stand-in readout
    # sigmoid([ece ; mix] @ w_out + b_out), computed as two (1,D)x(TN,D)^T
    # dots so the result is already lane-dense (1, TN) -> unmasked stores.
    ece = ece_ref[...]
    dn = (((1,), (1,)), ((), ()))
    r = jax.lax.dot_general(wo_ref[0:1, :], ece, dn,
                            preferred_element_type=jnp.float32)
    r = r + jax.lax.dot_general(wo_ref[1:2, :], mix, dn,
                                preferred_element_type=jnp.float32)
    rd_ref[...] = jax.nn.sigmoid(r + bo_ref[...])


def fused_row_pass(ecr, ece, w_gate, b_gate, w_out_rows, b_out, alpha,
                   tile_target=512):
    """Returns (dc, de, readout) with readout shaped (1, N) (lane-dense)."""
    n, d = ecr.shape
    # Tile must be a multiple of 128 (or the full N) so the lane-dense (1, tn)
    # readout block is legal.  For v7x's 64 MiB VMEM keep tile_target modest.
    tn = _pick_tile(n, tile_target, 128)
    nt = n // tn

    row_spec = pl.BlockSpec((tn, d), lambda i: (i, 0))
    full2 = lambda i: (0, 0)

    return pl.pallas_call(
        functools.partial(_fused_row_kernel, alpha=float(alpha), d=d),
        out_shape=(
            jax.ShapeDtypeStruct((n, d), jnp.float32),   # dc
            jax.ShapeDtypeStruct((n, d), jnp.float32),   # de
            jax.ShapeDtypeStruct((1, n), jnp.float32),   # readout (lane-dense)
        ),
        grid=(nt,),
        in_specs=[
            row_spec,                                     # ecr
            row_spec,                                     # ece
            pl.BlockSpec((d, 2 * d), full2),              # fused gate weight
            pl.BlockSpec((1, 2 * d), full2),              # fused gate bias
            pl.BlockSpec((2, d), full2),                  # readout weight rows
            pl.BlockSpec((1, 1), full2),                  # readout bias
        ],
        out_specs=(
            row_spec,
            row_spec,
            pl.BlockSpec((1, tn), lambda i: (0, i)),
        ),
        compiler_params=pltpu.CompilerParams(
            dimension_semantics=("parallel",)),
    )(ecr, ece, w_gate, b_gate, w_out_rows, b_out)


# --------------------------------------------------------------------------
# Tiled contrastive loss (exact port of RCDN_cfgkt.contrastive_loss)
# --------------------------------------------------------------------------

def _contrastive_kernel(a_ref, b_ref, loss_ref, pos_acc, neg_acc,
                        *, inv_t, tq, tk):
    qi = pl.program_id(0)
    ki = pl.program_id(1)

    @pl.when((qi == 0) & (ki == 0))
    def _():
        loss_ref[...] = jnp.zeros_like(loss_ref)

    @pl.when(ki == 0)
    def _():
        pos_acc[...] = jnp.zeros_like(pos_acc)
        neg_acc[...] = jnp.zeros_like(neg_acc)

    a = a_ref[...].astype(jnp.float32)
    b = b_ref[...].astype(jnp.float32)
    # F.normalize(dim=-1); rsqrt keeps the divide on the (idle) EUP slot.
    a = a * jax.lax.rsqrt(jnp.sum(a * a, axis=-1, keepdims=True) + 1e-24)
    b = b * jax.lax.rsqrt(jnp.sum(b * b, axis=-1, keepdims=True) + 1e-24)

    # sim block, contracting on the feature dim (no explicit transpose of b).
    sim = jax.lax.dot_general(a, b, (((1,), (1,)), ((), ())),
                              preferred_element_type=jnp.float32) * inv_t

    row = qi * tq + jax.lax.broadcasted_iota(jnp.int32, (tq, tk), 0)
    col = ki * tk + jax.lax.broadcasted_iota(jnp.int32, (tq, tk), 1)
    diag = row == col

    pos_acc[...] += jnp.sum(jnp.where(diag, sim, 0.0), axis=-1, keepdims=True)
    # Constant-max logsumexp: a, b are unit-norm so |sim| <= inv_t and
    # exp(sim - inv_t) <= 1 (no overflow for any temperature).
    neg_acc[...] += jnp.sum(jnp.where(diag, 0.0, jnp.exp(sim - inv_t)),
                            axis=-1, keepdims=True)

    @pl.when(ki == pl.num_programs(1) - 1)
    def _():
        # sum_i (log(neg_i) - pos_i) for the rows of this q-tile.
        per_row = jnp.log(neg_acc[...]) + inv_t - pos_acc[...]   # (tq, 1)
        loss_ref[...] += jnp.sum(per_row, keepdims=True)


def pallas_contrastive_loss(a, b, temperature=0.3, tile_target=256):
    n, d = a.shape
    t = _pick_tile(n, tile_target, 8)
    nq = n // t
    inv_t = 1.0 / float(temperature)

    loss = pl.pallas_call(
        functools.partial(_contrastive_kernel, inv_t=inv_t, tq=t, tk=t),
        out_shape=jax.ShapeDtypeStruct((1, 1), jnp.float32),
        grid=(nq, nq),
        in_specs=[
            pl.BlockSpec((t, d), lambda qi, ki: (qi, 0)),
            pl.BlockSpec((t, d), lambda qi, ki: (ki, 0)),
        ],
        out_specs=pl.BlockSpec((1, 1), lambda qi, ki: (0, 0)),
        scratch_shapes=[
            pltpu.VMEM((t, 1), jnp.float32),   # pos accumulator
            pltpu.VMEM((t, 1), jnp.float32),   # neg (exp-sum) accumulator
        ],
        compiler_params=pltpu.CompilerParams(
            dimension_semantics=("arbitrary", "arbitrary")),
    )(a, b)
    # loss = -mean(pos - log(neg)) = (1/n) * sum(log(neg) - pos)
    # NOTE: degenerate n == 1 gives log(0) = -inf, same as the PyTorch original.
    return loss[0, 0] / float(n)


# --------------------------------------------------------------------------
# Parameters (deterministic init) and forward glue
# --------------------------------------------------------------------------

def init_params(exercise_size, concept_size, input_dim):
    k = jax.random.PRNGKey(42)
    ks = jax.random.split(k, 6)
    s = 0.1
    d = input_dim
    return {
        # EmbeddingModule
        "exercise_emb": s * jax.random.normal(ks[0], (exercise_size + 1, d), jnp.float32),
        "concept_emb": s * jax.random.normal(ks[1], (concept_size + 1, d), jnp.float32),
        "response_emb": s * jax.random.normal(ks[2], (2, d), jnp.float32),
        # RCDN_CC / RCDN_EC stand-ins, stored pre-concatenated:
        # columns [:d] -> CC (sigmoid gate), [d:] -> EC (tanh projection).
        "w_gate": s * jax.random.normal(ks[3], (d, 2 * d), jnp.float32),
        "b_gate": jnp.zeros((1, 2 * d), jnp.float32),
        # CFGKT stand-in readout, stored row-wise:
        # row 0 multiplies exercise_concept_embedded, row 1 multiplies the mix.
        "w_out_rows": s * jax.random.normal(ks[4], (2, d), jnp.float32),
        "b_out": jnp.zeros((1, 1), jnp.float32),
    }


def rcdn_cfgkt_forward(params, concept_seq, response_seq, exercise_seq,
                       student_query_matrix, query_correct_sequence_ids,
                       taken_time_seq, interval_time_seq, alpha=0.5):
    B, L = concept_seq.shape
    D = params["exercise_emb"].shape[1]
    N = B * L

    # EmbeddingModule (glue: gathers)
    ex_e = jnp.take(params["exercise_emb"], exercise_seq, axis=0)      # [B,L,D]
    co_e = jnp.take(params["concept_emb"], concept_seq, axis=0)        # [B,L,D]
    re_e = jnp.take(params["response_emb"], response_seq, axis=0)      # [B,L,D]
    ece = (ex_e + co_e).astype(jnp.float32)          # exercise_concept_embedded
    ecr = (ece + re_e).astype(jnp.float32)           # exercise_concept_response

    ece_flat = ece.reshape(N, D)
    ecr_flat = ecr.reshape(N, D)

    # Fused row-tiled kernel: projections + denoise + alpha-mix + readout.
    # TODO(synk): student_query_matrix / query_correct_sequence_ids /
    # taken_time_seq / interval_time_seq unused (RCDN_CC & CFGKT sources not provided).
    dc, de, rd = fused_row_pass(
        ecr_flat, ece_flat,
        params["w_gate"], params["b_gate"],
        params["w_out_rows"], params["b_out"],
        alpha)

    # Contrastive loss (exact port of the PyTorch contrastive_loss), tiled.
    info_loss = pallas_contrastive_loss(dc, de, temperature=0.3)

    cfgkt_out = rd.reshape(B, L)
    return cfgkt_out, info_loss


# --------------------------------------------------------------------------

if __name__ == "__main__":
    B, L, D = 2, 8, 32
    exercise_size, concept_size = 20, 10
    col_student_num = 5
    n_at, n_it = 10, 12

    params = init_params(exercise_size, concept_size, D)

    key = jax.random.PRNGKey(0)
    k1, k2, k3, k4, k5, k6, k7 = jax.random.split(key, 7)
    concept_seq = jax.random.randint(k1, (B, L), 0, concept_size)
    response_seq = jax.random.randint(k2, (B, L), 0, 2)
    exercise_seq = jax.random.randint(k3, (B, L), 0, exercise_size)
    student_query_matrix = jax.random.uniform(k4, (B, col_student_num), jnp.float32)
    query_correct_sequence_ids = jax.random.randint(k5, (B, col_student_num, L), 0, 2)
    taken_time_seq = jax.random.randint(k6, (B, L), 0, n_at)
    interval_time_seq = jax.random.randint(k7, (B, L), 0, n_it)

    cfgkt_out, info_loss = rcdn_cfgkt_forward(
        params, concept_seq, response_seq, exercise_seq,
        student_query_matrix, query_correct_sequence_ids,
        taken_time_seq, interval_time_seq, alpha=0.5)

    jax.block_until_ready((cfgkt_out, info_loss))
    assert cfgkt_out.shape == (B, L)
    assert info_loss.shape == ()
    assert bool(jnp.isfinite(info_loss))
    print("KERNEL_OK")
</pallas_src>

<mosaic_0001>
module attributes {stable_mosaic.version = 11 : i64} {
  func.func @_fused_row_kernel(%arg0: i32, %arg1: memref<16x32xf32, #tpu.memory_space<vmem>>, %arg2: memref<16x32xf32, #tpu.memory_space<vmem>>, %arg3: memref<32x64xf32, #tpu.memory_space<vmem>>, %arg4: memref<1x64xf32, #tpu.memory_space<vmem>>, %arg5: memref<2x32xf32, #tpu.memory_space<vmem>>, %arg6: memref<1x1xf32, #tpu.memory_space<vmem>>, %arg7: memref<16x32xf32, #tpu.memory_space<vmem>>, %arg8: memref<16x32xf32, #tpu.memory_space<vmem>>, %arg9: memref<1x16xf32, #tpu.memory_space<vmem>>) attributes {dimension_semantics = [#tpu.dimension_semantics<parallel>], iteration_bounds = array<i64: 1>, scalar_prefetch = 0 : i64, scratch_operands = 0 : i64, tpu.core_type = #tpu.core_type<tc>, window_params = [{transform_indices = @transform_0, window_bounds = array<i64: 16, 32>}, {transform_indices = @transform_1, window_bounds = array<i64: 16, 32>}, {pipeline_mode = #tpu.pipeline_mode<synchronous>, transform_indices = @transform_2, window_bounds = array<i64: 32, 64>}, {pipeline_mode = #tpu.pipeline_mode<synchronous>, transform_indices = @transform_3, window_bounds = array<i64: 1, 64>}, {pipeline_mode = #tpu.pipeline_mode<synchronous>, transform_indices = @transform_4, window_bounds = array<i64: 2, 32>}, {pipeline_mode = #tpu.pipeline_mode<synchronous>, transform_indices = @transform_5, window_bounds = array<i64: 1, 1>}, {transform_indices = @transform_6, window_bounds = array<i64: 16, 32>}, {transform_indices = @transform_7, window_bounds = array<i64: 16, 32>}, {transform_indices = @transform_8, window_bounds = array<i64: 1, 16>}]} {
    %c0 = arith.constant 0 : index
    %c0_0 = arith.constant 0 : index
    %0 = vector.load %arg1[%c0, %c0_0] : memref<16x32xf32, #tpu.memory_space<vmem>>, vector<16x32xf32>
    %c0_1 = arith.constant 0 : index
    %c0_2 = arith.constant 0 : index
    %1 = vector.load %arg3[%c0_1, %c0_2] : memref<32x64xf32, #tpu.memory_space<vmem>>, vector<32x64xf32>
    %cst = arith.constant dense<0.000000e+00> : vector<16x64xf32>
    %2 = tpu.matmul %0, %1, %cst {dimension_numbers = #tpu.dot_dimension_numbers<[1], [0], [0], [1], [0, 0, 1, 1], [], []>} : vector<16x32xf32>, vector<32x64xf32>, vector<16x64xf32> -> vector<16x64xf32>
    %c0_3 = arith.constant 0 : index
    %c0_4 = arith.constant 0 : index
    %3 = vector.load %arg4[%c0_3, %c0_4] : memref<1x64xf32, #tpu.memory_space<vmem>>, vector<1x64xf32>
    %4 = vector.broadcast %3 : vector<1x64xf32> to vector<16x64xf32>
    %5 = arith.addf %2, %4 : vector<16x64xf32>
    %6 = vector.extract_strided_slice %5 {offsets = [0, 0], sizes = [16, 32], strides = [1, 1]} : vector<16x64xf32> to vector<16x32xf32>
    %7 = arith.negf %6 : vector<16x32xf32>
    %8 = math.exp %7 : vector<16x32xf32>
    %cst_5 = arith.constant 1.000000e+00 : f32
    %9 = vector.broadcast %cst_5 : f32 to vector<16x32xf32>
    %10 = arith.addf %9, %8 : vector<16x32xf32>
    %11 = arith.divf %9, %10 : vector<16x32xf32>
    %12 = vector.extract_strided_slice %5 {offsets = [0, 32], sizes = [16, 32], strides = [1, 1]} : vector<16x64xf32> to vector<16x32xf32>
    %13 = math.tanh %12 : vector<16x32xf32>
    %14 = arith.mulf %11, %0 : vector<16x32xf32>
    %15 = arith.mulf %13, %0 : vector<16x32xf32>
    %c0_6 = arith.constant 0 : index
    %c0_7 = arith.constant 0 : index
    %16 = vector.load %arg7[%c0_6, %c0_7] : memref<16x32xf32, #tpu.memory_space<vmem>>, vector<16x32xf32>
    tpu.vector_store %arg7[%c0_6, %c0_7], %14 {strides = array<i32>} : memref<16x32xf32, #tpu.memory_space<vmem>>, vector<16x32xf32>,
    %c0_8 = arith.constant 0 : index
    %c0_9 = arith.constant 0 : index
    %17 = vector.load %arg8[%c0_8, %c0_9] : memref<16x32xf32, #tpu.memory_space<vmem>>, vector<16x32xf32>
    tpu.vector_store %arg8[%c0_8, %c0_9], %15 {strides = array<i32>} : memref<16x32xf32, #tpu.memory_space<vmem>>, vector<16x32xf32>,
    %cst_10 = arith.constant 5.000000e-01 : f32
    %18 = vector.broadcast %cst_10 : f32 to vector<16x32xf32>
    %19 = arith.mulf %18, %14 : vector<16x32xf32>
    %cst_11 = arith.constant 5.000000e-01 : f32
    %20 = vector.broadcast %cst_11 : f32 to vector<16x32xf32>
    %21 = arith.mulf %20, %15 : vector<16x32xf32>
    %22 = arith.addf %19, %21 : vector<16x32xf32>
    %c0_12 = arith.constant 0 : index
    %c0_13 = arith.constant 0 : index
    %23 = vector.load %arg2[%c0_12, %c0_13] : memref<16x32xf32, #tpu.memory_space<vmem>>, vector<16x32xf32>
    %c0_14 = arith.constant 0 : index
    %c0_15 = arith.constant 0 : index
    %24 = vector.load %arg5[%c0_14, %c0_15] : memref<2x32xf32, #tpu.memory_space<vmem>>, vector<1x32xf32>
    %cst_16 = arith.constant dense<0.000000e+00> : vector<1x16xf32>
    %25 = tpu.matmul %24, %23, %cst_16 {dimension_numbers = #tpu.dot_dimension_numbers<[1], [1], [0], [0], [0, 0, 1, 0], [], []>} : vector<1x32xf32>, vector<16x32xf32>, vector<1x16xf32> -> vector<1x16xf32>
    %c1 = arith.constant 1 : index
    %c0_17 = arith.constant 0 : index
    %26 = vector.load %arg5[%c1, %c0_17] : memref<2x32xf32, #tpu.memory_space<vmem>>, vector<1x32xf32>
    %cst_18 = arith.constant dense<0.000000e+00> : vector<1x16xf32>
    %27 = tpu.matmul %26, %22, %cst_18 {dimension_numbers = #tpu.dot_dimension_numbers<[1], [1], [0], [0], [0, 0, 1, 0], [], []>} : vector<1x32xf32>, vector<16x32xf32>, vector<1x16xf32> -> vector<1x16xf32>
    %28 = arith.addf %25, %27 : vector<1x16xf32>
    %c0_19 = arith.constant 0 : index
    %c0_20 = arith.constant 0 : index
    %29 = vector.load %arg6[%c0_19, %c0_20] : memref<1x1xf32, #tpu.memory_space<vmem>>, vector<1x1xf32>
    %30 = vector.broadcast %29 : vector<1x1xf32> to vector<1x16xf32>
    %31 = arith.addf %28, %30 : vector<1x16xf32>
    %32 = arith.negf %31 : vector<1x16xf32>
    %33 = math.exp %32 : vector<1x16xf32>
    %cst_21 = arith.constant 1.000000e+00 : f32
    %34 = vector.broadcast %cst_21 : f32 to vector<1x16xf32>
    %35 = arith.addf %34, %33 : vector<1x16xf32>
    %36 = arith.divf %34, %35 : vector<1x16xf32>
    %c0_22 = arith.constant 0 : index
    %c0_23 = arith.constant 0 : index
    %37 = vector.load %arg9[%c0_22, %c0_23] : memref<1x16xf32, #tpu.memory_space<vmem>>, vector<1x16xf32>
    tpu.vector_store %arg9[%c0_22, %c0_23], %36 {strides = array<i32>} : memref<1x16xf32, #tpu.memory_space<vmem>>, vector<1x16xf32>,
    return
  }
  func.func @transform_0(%arg0: i32) -> (i32, i32) {
    %c0_i32 = arith.constant 0 : i32
    %c0_i32_0 = arith.constant 0 : i32
    return %arg0, %c0_i32 : i32, i32
  }
  func.func @transform_1(%arg0: i32) -> (i32, i32) {
    %c0_i32 = arith.constant 0 : i32
    %c0_i32_0 = arith.constant 0 : i32
    return %arg0, %c0_i32 : i32, i32
  }
  func.func @transform_2(%arg0: i32) -> (i32, i32) {
    %c0_i32 = arith.constant 0 : i32
    %c0_i32_0 = arith.constant 0 : i32
    %c0_i32_1 = arith.constant 0 : i32
    return %c0_i32, %c0_i32_0 : i32, i32
  }
  func.func @transform_3(%arg0: i32) -> (i32, i32) {
    %c0_i32 = arith.constant 0 : i32
    %c0_i32_0 = arith.constant 0 : i32
    %c0_i32_1 = arith.constant 0 : i32
    return %c0_i32, %c0_i32_0 : i32, i32
  }
  func.func @transform_4(%arg0: i32) -> (i32, i32) {
    %c0_i32 = arith.constant 0 : i32
    %c0_i32_0 = arith.constant 0 : i32
    %c0_i32_1 = arith.constant 0 : i32
    return %c0_i32, %c0_i32_0 : i32, i32
  }
  func.func @transform_5(%arg0: i32) -> (i32, i32) {
    %c0_i32 = arith.constant 0 : i32
    %c0_i32_0 = arith.constant 0 : i32
    %c0_i32_1 = arith.constant 0 : i32
    return %c0_i32, %c0_i32_0 : i32, i32
  }
  func.func @transform_6(%arg0: i32) -> (i32, i32) {
    %c0_i32 = arith.constant 0 : i32
    %c0_i32_0 = arith.constant 0 : i32
    return %arg0, %c0_i32 : i32, i32
  }
  func.func @transform_7(%arg0: i32) -> (i32, i32) {
    %c0_i32 = arith.constant 0 : i32
    %c0_i32_0 = arith.constant 0 : i32
    return %arg0, %c0_i32 : i32, i32
  }
  func.func @transform_8(%arg0: i32) -> (i32, i32) {
    %c0_i32 = arith.constant 0 : i32
    %c0_i32_0 = arith.constant 0 : i32
    return %c0_i32, %arg0 : i32, i32
  }
}

</mosaic_0001>

<bundles_post_ra>
// kernel: tpu_custom_call.1
= control target key start
LH: loop header
LB: loop body
LE: loop exit
PB: predicated region body
PF: predicated region fallthrough
CT: control target
= control target key end

     0   :  { %s870_s0 = inlined_call_operand.hbm [shape: f32[16,32], index: 0, kind: input, shape index: {}]   ;;  %s871_s1 = inlined_call_operand.hbm [shape: f32[16,32], index: 1, kind: input, shape index: {}]   ;;  %s872_s2 = inlined_call_operand.hbm [shape: f32[32,64], index: 2, kind: input, shape index: {}]   ;;  %s873_s3 = inlined_call_operand.vmem [shape: f32[1,64], index: 3, kind: input, shape index: {}]   ;;  %s874_s4 = inlined_call_operand.vmem [shape: f32[2,32], index: 4, kind: input, shape index: {}]   ;;  %s875_s5 = inlined_call_operand.<no memory space> [shape: f32[1,1], index: 5, kind: input, shape index: {}]   ;;  %s876_s6 = inlined_call_operand.hbm [shape: f32[16,32], index: 6, kind: output, shape index: {0}]   ;;  %s877_s7 = inlined_call_operand.hbm [shape: f32[16,32], index: 7, kind: output, shape index: {1}]   ;;  %s878_s8 = inlined_call_operand.hbm [shape: f32[1,16], index: 8, kind: output, shape index: {2}]  }
   0x1   :  { %v14_v0 = vstv %s875_s5 }
   0x2   :  { %15 = vst [vmem:[#allocation2] sm:$0x1] %v14_v0 }
   0x3   :  { %16 = vsyncpa [#allocation4], 0 }
   0x4   :  { %17 = vsyncpa [#allocation7], 0 }
   0x5   :  { %18 = vsyncpa [#allocation5], 0 }
   0x6   :  { %19 = vsyncpa [#allocation11], 0  ;;  %s680_s29 = smov [#allocation6]   ;;  %s681_s9 = smov [#allocation3]  }
   0x7   :  { %s37_s30 = sshll.u32 %s680_s29, 4  ;;  %s25_s10 = sshll.u32 %s681_s9, 4  ;;  %s38_s30 = int_to_ptr.vmem [resolvable:$true] %s37_s30  ;;  %s742_s10 = int_to_ptr.vmem [resolvable:$true] %s25_s10 }
   0x8   :  { %s540_s13 = scalar_lea.hbm %s871_s1, 256 }
   0x9   :  { %p541_p0 = scmp.ne.s32.totalorder %s871_s1, %s540_s13  ;;  %p544_p1 = scmp.lt.u32.totalorder %s540_s13, %s871_s1 }
   0xb   :  { %p546_p2 = pnand %p544_p1, %p541_p0 }
   0xd   :  { %549 = shalt.err (!%p546_p2)
}
   0xe   :  { %s550_s17 = scalar_lea.vmem %s38_s30, 256  ;;  %p555_p4 = scmp.lt.s32.totalorder %s38_s30, %s38_s30 }
   0xf   :  { %p551_p3 = scmp.ne.s32.totalorder %s38_s30, %s550_s17  ;;  %p556_p5 = scmp.lt.s32.totalorder %s550_s17, %s550_s17 }
  0x11   :  { %p557_p6 = por %p556_p5, %p555_p4 }
  0x13   :  { %p558_p7 = pnand %p557_p6, %p551_p3 }
  0x15   :  { %561 = shalt.err (!%p558_p7)
}
  0x16   :  { %s682_s18 = smov 128   ;;  %s683_s19 = smov 8  }
  0x17   :  { %43 = dma.hbm_to_vmem [thread:$0]  %s871_s1, 256, %s38_s30, [#allocation7], %s682_s18, %s682_s18, %s683_s19  }
  0x18   :  { %s562_s24 = scalar_lea.hbm %s870_s0, 256 }
  0x19   :  { %p563_p8 = scmp.ne.s32.totalorder %s870_s0, %s562_s24  ;;  %p566_p9 = scmp.lt.u32.totalorder %s562_s24, %s870_s0 }
  0x1b   :  { %p568_p10 = pnand %p566_p9, %p563_p8 }
  0x1d   :  { %571 = shalt.err (!%p568_p10)
}
  0x1e   :  { %s572_s29 = scalar_lea.vmem %s742_s10, 256  ;;  %p577_p12 = scmp.lt.s32.totalorder %s742_s10, %s742_s10 }
  0x1f   :  { %p573_p11 = scmp.ne.s32.totalorder %s742_s10, %s572_s29  ;;  %p578_p13 = scmp.lt.s32.totalorder %s572_s29, %s572_s29 }
  0x21   :  { %p579_p0 = por %p578_p13, %p577_p12 }
  0x23   :  { %p580_p1 = pnand %p579_p0, %p573_p11 }
  0x25   :  { %583 = shalt.err (!%p580_p1)
}
  0x26   :  { %31 = dma.hbm_to_vmem [thread:$0]  %s870_s0, 256, %s742_s10, [#allocation4], %s682_s18, %s682_s18, %s683_s19  }
  0x27   :  { %s684_s9 = smov [#allocation8]   ;;  %s584_s14 = scalar_lea.hbm %s872_s2, 512 }
  0x28   :  { %s49_s11 = sshll.u32 %s684_s9, 4  ;;  %p585_p2 = scmp.ne.s32.totalorder %s872_s2, %s584_s14  ;;  %s50_s11 = int_to_ptr.vmem [resolvable:$true] %s49_s11 }
  0x29   :  { %p588_p3 = scmp.lt.u32.totalorder %s584_s14, %s872_s2 }
  0x2b   :  { %p590_p4 = pnand %p588_p3, %p585_p2 }
  0x2d   :  { %593 = shalt.err (!%p590_p4)
}
  0x2e   :  { %s594_s20 = scalar_lea.vmem %s50_s11, 512  ;;  %p599_p6 = scmp.lt.s32.totalorder %s50_s11, %s50_s11 }
  0x2f   :  { %p595_p5 = scmp.ne.s32.totalorder %s50_s11, %s594_s20  ;;  %p600_p7 = scmp.lt.s32.totalorder %s594_s20, %s594_s20 }
  0x31   :  { %p601_p8 = por %p600_p7, %p599_p6 }
  0x33   :  { %p602_p9 = pnand %p601_p8, %p595_p5 }
  0x35   :  { %605 = shalt.err (!%p602_p9)
}
  0x36   :  { %55 = dma.hbm_to_vmem [thread:$0]  %s872_s2, 512, %s50_s11, [#allocation7], %s682_s18, %s682_s18, %s683_s19  }
  0x37   :  { %672 = dma.done.wait [#allocation4], 256  }
  0x38   :  { %673 = vsyncadd [#allocation4], 4294967040 }
  0x39   :  { %674 = dma.done.wait [#allocation7], 768  }
  0x3a   :  { %675 = vsyncadd [#allocation7], 4294966528  ;;  %vm84_vm0 = vcmask 261120   ;;  %v73_v1 = vld [vmem:[#allocation8] sm:$0xff]  ;;  %v74_v2 = vld [vmem:[#allocation8 + $0x8] sm:$0xff]  ;;  %s685_s21 = smov 32  }
  0x3b   :  { %v75_v3 = vld [vmem:[#allocation8 + $0x10] sm:$0xff]  ;;  %v493_v4 = vpack.c.bf16 %v74_v2, %v73_v1  ;;  %v76_v5 = vld [vmem:[#allocation8 + $0x18] sm:$0xff]  ;;  %v71_v6 = vld [vmem:[#allocation3] sm:$0xff]  ;;  %v686_v20 = vmov 0.0|0.0   ;;  %s687_s24 = smov 96   ;;  %vm688_vm2 = vmmov 0  }
  0x3c   :  { %v497_v7 = vpack.c.bf16 %v76_v5, %v75_v3  ;;  %476 = vmatprep.mubr.msk.f32.mxu0 %vm84_vm0, %v71_v6  ;;  %182 = vrot.lane.b32.xlu0 %v71_v6, %s685_s21  ;;  %v72_v8 = vld [vmem:[#allocation3 + $0x8] sm:$0xff]  ;;  %v444_v9 = vld [vmem:[%s873_s3] ss:$0 sm:$0xff]  ;;  %v216_v17 = vld [vmem:[#allocation6] sm:$0xff]  ;;  %v689_v33 = vmov 0.0   ;;  %v690_v36 = vmov 0  }
  0x3d   :  { %494 = vmatprep.subr.bf16.mxu0 %v493_v4  ;;  %v217_v18 = vld [vmem:[#allocation6 + $0x8] sm:$0xff]  ;;  %501 = vmatprep.subr.bf16.mxu1 %v686_v20  ;;  %vm801_vm1 = vmpackc.low %vm84_vm0, %vm84_vm0  ;;  %v219_v50 = vld [vmem:[%s874_s4 + $0x1] sm:$0x1]  ;;  %s691_s27 = smov [#allocation10]   ;;  %s692_s29 = smov [#allocation9]  }
  0x3e   :  { %496 = vmatpush3.bf16.msra.mxu0 %v493_v4  ;;  %v506_v19 = vpack.c.bf16 %v217_v18, %v216_v17  ;;  %v218_v32 = vld [vmem:[%s874_s4] sm:$0x1]  ;;  %483 = vmatprep.mubr.msk.f32.mxu1 %vm688_vm2, %v689_v33  ;;  %s414_s28 = sshll.u32 %s691_s27, 4  ;;  %s402_s1 = sshll.u32 %s692_s29, 4  ;;  %s415_s28 = int_to_ptr.vmem [resolvable:$true] %s414_s28  ;;  %s821_s1 = int_to_ptr.vmem [resolvable:$true] %s402_s1 }
  0x3f   :  { %498 = vmatprep.subr.bf16.mxu0 %v497_v7  ;;  %v378_v35 = vld [vmem:[#allocation2] sm:$0x1]  ;;  %523 = vset.pattern.permute.xlu0 %v690_v36  ;;  %s606_s30 = scalar_lea.vmem %s415_s28, 256  ;;  %p611_p11 = scmp.lt.s32.totalorder %s415_s28, %s415_s28 }
  0x40   :  { %184 = vrot.lane.b32.xlu0 %v72_v8, %s685_s21  ;;  %p607_p10 = scmp.ne.s32.totalorder %s415_s28, %s606_s30  ;;  %p612_p12 = scmp.lt.s32.totalorder %s606_s30, %s606_s30 }
  0x42   :  { %500 = vmatpush3.bf16.msra.mxu0 %v497_v7  ;;  %p613_p13 = por %p612_p12, %p611_p11 }
  0x43   :  { %505 = vmatprep.subr.bf16.mxu0 %v686_v20 }
  0x44   :  { %381 = vperm.xlu0 %523, %v378_v35   ;;  %p614_p0 = pnand %p613_p13, %p607_p10 }
  0x45   :  { %477 = vmatmul.mubr.msk.f32.vlgmr.msra.gmra.mrb[0].mxu0 %vm84_vm0, %v72_v8 }
  0x46   :  { %490 = vmatprep.mubr.msk.f32.mxu0 %vm688_vm2, %v689_v33 }
  0x4b   :  { %508 = vmatpush3.bf16.xpose.msk.msra.mxu0 %vm801_vm1, %v506_v19 }
  0x52   :  { %491 = vmatmul.mubr.msk.f32.vlgmr.msra.gmra.mrb[2].mxu0 %vm84_vm0, %v218_v32 }
  0xae   :  { %v183_v16 = vpop.permute.xlu0 %182 }
  0xb2   :  { %v185_v24 = vpop.permute.xlu0 %184 }
 0x118   :  { %v478_v10 = vpop.f32.mrb[0].mxu0 }
 0x119   :  { %v163_v11 = vadd.f32 %v478_v10, %v444_v9  ;;  %v157_v12 = vpop.f32.mrb[1].mxu0 }
 0x11a   :  { %v158_v13 = vadd.f32 %v444_v9, %v157_v12 }
 0x11b   :  { %v448_v14 = vmul.f32 -1.442695, %v163_v11  ;;  %524 = vtanh.f32 %v163_v11 }
 0x11c   :  { %v447_v15 = vmul.f32 -1.442695, %v158_v13  ;;  %526 = vtanh.f32 %v158_v13 }
 0x11d   :  { %528 = vpow2.f32 %v448_v14 }
 0x11e   :  { %530 = vpow2.f32 %v447_v15 }
 0x125   :  { %v525_v22 = vpop.eup %524  ;;  %v374_v51 = vpop.f32.mrb[2].mxu0 }
 0x126   :  { %v527_v23 = vpop.eup %526  ;;  %v189_v30 = vmul.f32 %v525_v22, %v185_v24  ;;  %v492_v52 = vpop.f32.mrb[3].mxu0 }
 0x127   :  { %v529_v25 = vpop.eup %528  ;;  %v188_v26 = vmul.f32 %v527_v23, %v183_v16 }
 0x128   :  { %v531_v27 = vpop.eup %530  ;;  %v173_v28 = vadd.f32 1.0, %v529_v25  ;;  %v205_v34 = vmul.f32 0.5, %v189_v30 }
 0x129   :  { %v172_v29 = vadd.f32 1.0, %v531_v27  ;;  %v204_v31 = vmul.f32 0.5, %v188_v26 }
 0x12a   :  { %532 = vrcp.f32 %v173_v28 }
 0x12b   :  { %534 = vrcp.f32 %v172_v29  ;;  %208 = vrot.lane.b32.xlu1 %v204_v31, %s687_s24 }
 0x12f   :  { %210 = vrot.lane.b32.xlu1 %v205_v34, %s687_s24 }
 0x133   :  { %194 = vrot.lane.b32.xlu1 %v188_v26, %s687_s24 }
 0x134   :  { %v533_v37 = vpop.eup %532 }
 0x135   :  { %v535_v38 = vpop.eup %534  ;;  %v181_v39 = vmul.f32 %v533_v37, %v72_v8 }
 0x136   :  { %v180_v40 = vmul.f32 %v535_v38, %v71_v6 }
 0x137   :  { %196 = vrot.lane.b32.xlu1 %v189_v30, %s687_s24  ;;  %191 = vst.msk [vmem:[#allocation9 + $0x8] sm:$0xff] %vm84_vm0, %v181_v39  ;;  %v203_v43 = vmul.f32 0.5, %v181_v39 }
 0x138   :  { %190 = vst.msk [vmem:[#allocation9] sm:$0xff] %vm84_vm0, %v180_v40  ;;  %v202_v42 = vmul.f32 0.5, %v180_v40 }
 0x19d   :  { %v209_v41 = vpop.permute.xlu1 %208 }
 0x19e   :  { %v214_v45 = vadd.f32 %v209_v41, %v202_v42 }
 0x1a1   :  { %v211_v44 = vpop.permute.xlu1 %210 }
 0x1a2   :  { %v215_v46 = vadd.f32 %v211_v44, %v203_v43 }
 0x1a4   :  { %v502_v47 = vpack.c.bf16 %v215_v46, %v214_v45 }
 0x1a5   :  { %v195_v48 = vpop.permute.xlu1 %194 }
 0x1a6   :  { %200 = vst.msk [vmem:[#allocation10] sm:$0xff] %vm84_vm0, %v195_v48  ;;  %504 = vmatpush3.bf16.xpose.msk.msra.mxu1 %vm801_vm1, %v502_v47 }
 0x1a9   :  { %v197_v49 = vpop.permute.xlu1 %196 }
 0x1aa   :  { %201 = vst.msk [vmem:[#allocation10 + $0x8] sm:$0xff] %vm84_vm0, %v197_v49 }
 0x1ad   :  { %484 = vmatmul.mubr.msk.f32.vlgmr.msra.gmra.mrb[0].mxu1 %vm84_vm0, %v219_v50 }
 0x1ae   :  { %617 = shalt.err (!%p614_p0)
}
 0x1af   :  { %s618_s11 = scalar_lea.hbm %s877_s7, 256 }
 0x1b0   :  { %p619_p1 = scmp.ne.s32.totalorder %s877_s7, %s618_s11  ;;  %p622_p2 = scmp.lt.u32.totalorder %s618_s11, %s877_s7 }
 0x1b2   :  { %p624_p3 = pnand %p622_p2, %p619_p1 }
 0x1b4   :  { %627 = shalt.err (!%p624_p3)
}
 0x1b5   :  { %420 = dma.vmem_to_hbm [thread:$0]  %s415_s28, 256, %s877_s7, [#allocation11], %s682_s18, %s682_s18, %s683_s19  }
 0x1b6   :  { %s628_s17 = scalar_lea.vmem %s821_s1, 256  ;;  %p633_p5 = scmp.lt.s32.totalorder %s821_s1, %s821_s1 }
 0x1b7   :  { %p629_p4 = scmp.ne.s32.totalorder %s821_s1, %s628_s17  ;;  %p634_p6 = scmp.lt.s32.totalorder %s628_s17, %s628_s17 }
 0x1b9   :  { %p635_p7 = por %p634_p6, %p633_p5 }
 0x1bb   :  { %p636_p8 = pnand %p635_p7, %p629_p4 }
 0x1bd   :  { %639 = shalt.err (!%p636_p8)
}
 0x1be   :  { %s640_s10 = scalar_lea.hbm %s876_s6, 256 }
 0x1bf   :  { %p641_p9 = scmp.ne.s32.totalorder %s876_s6, %s640_s10  ;;  %p644_p10 = scmp.lt.u32.totalorder %s640_s10, %s876_s6 }
 0x1c1   :  { %p646_p11 = pnand %p644_p10, %p641_p9 }
 0x1c3   :  { %649 = shalt.err (!%p646_p11)
}
 0x1c4   :  { %408 = dma.vmem_to_hbm [thread:$0]  %s821_s1, 256, %s876_s6, [#allocation5], %s682_s18, %s682_s18, %s683_s19   ;;  %v384_v53 = vlaneseq  ;;  %v382_v56 = vpop.permute.xlu0 %381  ;;  %vm395_vm3 = vcmask 122880  }
 0x1c5   :  { %s693_s24 = smov [#allocation12]  }
 0x1c6   :  { %v385_v54 = vshrl.u32 %v384_v53, 7  ;;  %s427_s25 = sshll.u32 %s693_s24, 4  ;;  %s428_s25 = int_to_ptr.vmem [resolvable:$true] %s427_s25 }
 0x1c7   :  { %s650_s6 = scalar_lea.vmem %s428_s25, 16  ;;  %s654_s18 = scalar_lea.vmem %s428_s25, 32 }
 0x1c8   :  { %v386_v55 = vsub.s32 0, %v385_v54  ;;  %p651_p12 = scmp.ne.s32.totalorder %s428_s25, %s650_s6  ;;  %p655_p13 = scmp.lt.s32.totalorder %s428_s25, %s428_s25 }
 0x1c9   :  { %p656_p0 = scmp.lt.s32.totalorder %s654_s18, %s650_s6 }
 0x1ca   :  { %v387_v57 = vrot.slane %v382_v56, %v386_v55 }
 0x1cb   :  { %p657_p1 = por %p656_p0, %p655_p13 }
 0x1cd   :  { %p658_p2 = pnand %p657_p1, %p651_p12 }
 0x280   :  { %v295_v58 = vpop.f32.mrb[0].mxu1 }
 0x281   :  { %v375_v59 = vadd.f32 %v374_v51, %v295_v58  ;;  %v485_v60 = vpop.f32.mrb[1].mxu1 }
 0x283   :  { %v388_v61 = vadd.f32 %v387_v57, %v375_v59 }
 0x285   :  { %v455_v62 = vmul.f32 -1.442695, %v388_v61 }
 0x287   :  { %536 = vpow2.f32 %v455_v62 }
 0x291   :  { %v537_v63 = vpop.eup %536 }
 0x292   :  { %v392_v0 = vadd.f32 1.0, %v537_v63 }
 0x294   :  { %538 = vrcp.f32 %v392_v0 }
 0x29e   :  { %v539_v1 = vpop.eup %538 }
 0x29f   :  { %396 = vst.msk [vmem:[#allocation12] sm:$0x1] %vm395_vm3, %v539_v1 }
 0x2a0   :  { %661 = shalt.err (!%p658_p2)
}
 0x2a1   :  { %s662_s27 = scalar_lea.hbm %s878_s8, 16 }
 0x2a2   :  { %p663_p3 = scmp.ne.s32.totalorder %s878_s8, %s662_s27  ;;  %p666_p4 = scmp.lt.u32.totalorder %s662_s27, %s878_s8 }
 0x2a4   :  { %p668_p5 = pnand %p666_p4, %p663_p3 }
 0x2a6   :  { %671 = shalt.err (!%p668_p5)
}
 0x2a7   :  { %430 = dma.vmem_to_hbm [thread:$0]  %s428_s25, 16, %s878_s8, [#allocation11]  }
 0x2a8   :  { %676 = dma.done.wait [#allocation5], 256  }
 0x2a9   :  { %677 = vsyncadd [#allocation5], 4294967040 }
 0x2aa   :  { %678 = dma.done.wait [#allocation11], 272  }
 0x2ab   :  { %679 = vsyncadd [#allocation11], 4294967024 }
 0x2ac   :  { %440 = vsyncpa [#allocation4], 1 }
 0x2ad   :  { %441 = vsyncpa [#allocation7], 1 }
 0x2ae   :  { %442 = vsyncpa [#allocation5], 1 }
 0x2af   :  { %443 = vsyncpa [#allocation11], 1 }

</bundles_post_ra>
